<compile_context>
chip_gen: v7x
topology: tpu7x:2x2x1
jax: 0.10.0
libtpu: 0.0.40
codegen_flags: <defaults>
</compile_context>

<pallas_src>
import functools

import jax
import jax.numpy as jnp
from jax.experimental import pallas as pl
from jax.experimental.pallas import tpu as pltpu


# ----------------------------------------------------------------------------
# Banded weight construction (wrapper-side, pure JAX, tiny):
#   band[ky, wi*Cin + ci, wo*Cout + co] = w[ky, wi-wo+1, ci, co]  if |wi-wo|<=1
#                                         else 0
# so that   out_rows = sum_ky  slab[ky : ky+M, :] @ band[ky]
# implements a SAME 3x3 conv on the lane-dense (rows, W*C) packed layout,
# folding the 3 kx taps AND the width-direction zero padding into the
# contraction.
# ----------------------------------------------------------------------------
def _build_band(w_hwio, W):
    Kh, Kw, Cin, Cout = w_hwio.shape
    wi = jnp.arange(W)[:, None]
    wo = jnp.arange(W)[None, :]
    kx = wi - wo + 1                                      # (W, W)
    valid = (kx >= 0) & (kx < Kw)
    g = w_hwio[:, jnp.clip(kx, 0, Kw - 1), :, :]          # (Kh, W, W, Cin, Cout)
    g = jnp.where(valid[None, :, :, None, None], g, 0.0)
    band = jnp.transpose(g, (0, 1, 3, 2, 4)).reshape(Kh, W * Cin, W * Cout)
    return band


# ----------------------------------------------------------------------------
# Fused kernel: conv1(+relu) -> conv2(+relu) -> conv3(+residual+relu)
# One grid step = B batch-stacked images.  All intermediates stay in VMEM.
# ----------------------------------------------------------------------------
def _fused_resblock_kernel(x_ref, w1_ref, b1_ref, w2_ref, b2_ref,
                           w3_ref, b3_ref, o_ref, pm1_ref, pm2_ref, *, H, B):
    T = B * (H + 1) + 1          # slab rows: top halo + B*(image + separator)
    m = T - 2                    # matmul M dimension (all interior slab rows)
    f32 = jnp.float32
    bf16 = jnp.bfloat16

    def band_conv(slab, w_ref):
        # 3 row-shifted taps against banded weights; bf16 operands, f32 accum.
        acc = jnp.dot(slab[0:m, :].astype(bf16), w_ref[0],
                      preferred_element_type=f32)
        acc = acc + jnp.dot(slab[1:1 + m, :].astype(bf16), w_ref[1],
                            preferred_element_type=f32)
        acc = acc + jnp.dot(slab[2:2 + m, :].astype(bf16), w_ref[2],
                            preferred_element_type=f32)
        return acc

    zrow = jnp.zeros((1, o_ref.shape[-1]), f32)

    def store_slab(dst_ref, act):
        # Bulk store of all conv output rows, then re-zero only the halo and
        # shared separator rows (no full zero-fill of the slab).
        dst_ref[pl.ds(1, m), :] = act
        dst_ref[pl.ds(0, 1), :] = zrow                     # top halo
        dst_ref[pl.ds(T - 1, 1), :] = zrow                 # bottom halo
        for i in range(B - 1):                             # shared separators
            dst_ref[pl.ds((i + 1) * (H + 1), 1), :] = zrow

    # conv1 (+bias, ReLU) over the whole batch-stacked slab.
    act1 = jnp.maximum(band_conv(x_ref[0], w1_ref) + b1_ref[...], 0.0)
    store_slab(pm1_ref, act1)                              # out1, padded, VMEM

    # conv2 (+bias, ReLU); out1 never touches HBM.
    act2 = jnp.maximum(band_conv(pm1_ref[...], w2_ref) + b2_ref[...], 0.0)
    store_slab(pm2_ref, act2)                              # out2, padded, VMEM

    # conv3 + bias + residual(out1) + ReLU (all in f32).
    out = jnp.maximum(band_conv(pm2_ref[...], w3_ref) + b3_ref[...] + act1, 0.0)

    # Drop separator rows: scatter each image's H rows to the output block.
    for i in range(B):
        r0 = i * (H + 1)
        o_ref[i] = out[r0:r0 + H, :].astype(o_ref.dtype)


# ----------------------------------------------------------------------------
# Wrapper: layout packing, banded weights, pallas_call plumbing.
# ----------------------------------------------------------------------------
def binary_module_forward(x1_nchw, x2_nchw, params):
    """Pallas equivalent of Binary_module.forward. Returns (out_nchw, saved_map)."""
    N, C_half, H, W = x1_nchw.shape
    Cin = 2 * C_half
    Cout = params["b1"].shape[0]
    WCin = W * Cin
    WCo = W * Cout

    # Batch-stacking factor: target an MXU-friendly M per grid step
    # (~256 rows for v6e/v7x; tune to ~128 on v5e).
    B = min(N, max(1, 256 // (H + 1)))
    while N % B:
        B -= 1
    G = N // B
    T = B * (H + 1) + 1
    m = T - 2

    # NCHW -> lane-dense, batch-stacked slab (G, T, W*Cin) with the 1-row zero
    # halos/separators inserted wrapper-side (fuses into the packing copy).
    x = jnp.concatenate([x1_nchw, x2_nchw], axis=1)               # (N,Cin,H,W)
    x = jnp.transpose(x, (0, 2, 3, 1)).reshape(N, H, WCin)        # (N,H,W*Cin)
    x = x.reshape(G, B, H, WCin)
    x = jnp.pad(x, ((0, 0), (0, 0), (0, 1), (0, 0)))              # per-image sep
    x = x.reshape(G, B * (H + 1), WCin)
    x_slab = jnp.pad(x, ((0, 0), (1, 0), (0, 0)))                 # top halo

    # Banded weights (bf16 for the MXU) and lane-dense f32 bias rows.
    # NOTE: band matrices are O(W^2 * Cin * Cout); bf16 halves their VMEM/DMA —
    # re-budget (and width-tile) before scaling W, especially on v7x (64 MiB).
    w1b = _build_band(params["w1"], W).astype(jnp.bfloat16)       # (3,WCin,WCo)
    w2b = _build_band(params["w2"], W).astype(jnp.bfloat16)       # (3,WCo, WCo)
    w3b = _build_band(params["w3"], W).astype(jnp.bfloat16)
    b1 = jnp.tile(params["b1"], W).reshape(1, WCo).astype(jnp.float32)
    b2 = jnp.tile(params["b2"], W).reshape(1, WCo).astype(jnp.float32)
    b3 = jnp.tile(params["b3"], W).reshape(1, WCo).astype(jnp.float32)

    x_spec = pl.BlockSpec((1, T, WCin), lambda g: (g, 0, 0))
    w1_spec = pl.BlockSpec((3, WCin, WCo), lambda g: (0, 0, 0))
    w_spec = pl.BlockSpec((3, WCo, WCo), lambda g: (0, 0, 0))
    b_spec = pl.BlockSpec((1, WCo), lambda g: (0, 0))
    o_spec = pl.BlockSpec((B, H, WCo), lambda g: (g, 0, 0))

    flops = G * 6 * m * WCo * (WCin + 2 * WCo)
    bytes_accessed = (4 * x_slab.size
                      + 2 * (w1b.size + w2b.size + w3b.size)
                      + 4 * 3 * WCo
                      + 4 * N * H * WCo)

    out_packed = pl.pallas_call(
        functools.partial(_fused_resblock_kernel, H=H, B=B),
        out_shape=jax.ShapeDtypeStruct((N, H, WCo), jnp.float32),
        grid_spec=pltpu.PrefetchScalarGridSpec(
            num_scalar_prefetch=0,
            grid=(G,),
            in_specs=[x_spec, w1_spec, b_spec, w_spec, b_spec, w_spec, b_spec],
            out_specs=o_spec,
            scratch_shapes=[
                pltpu.VMEM((T, WCo), jnp.float32),   # padded out1 slab
                pltpu.VMEM((T, WCo), jnp.float32),   # padded out2 slab
            ],
        ),
        compiler_params=pltpu.CompilerParams(
            dimension_semantics=("parallel",),
            vmem_limit_bytes=32 * 1024 * 1024,
        ),
        cost_estimate=pl.CostEstimate(
            flops=flops, transcendentals=0, bytes_accessed=bytes_accessed),
    )(x_slab, w1b, b1, w2b, b2, w3b, b3)

    # (N, H, W*Cout) -> NCHW for the PyTorch-style interface.
    out = out_packed.reshape(N, H, W, Cout).transpose(0, 3, 1, 2)
    saved_map = out[0]                                   # self.saved_map
    return out, saved_map


# ----------------------------------------------------------------------------
# Deterministic parameter init (shapes from nn.Conv2d in __init__)
# ----------------------------------------------------------------------------
def init_params(key, num_input, num_output):
    ks = jax.random.split(key, 6)

    def conv_w(k, cout, cin):
        # PyTorch weight layout OIHW -> HWIO for the channels-last math.
        w_oihw = jax.random.normal(k, (cout, cin, 3, 3), jnp.float32) * 0.1
        return jnp.transpose(w_oihw, (2, 3, 1, 0))       # (3,3,Cin,Cout)

    return {
        "w1": conv_w(ks[0], num_output, num_input),
        "b1": jax.random.normal(ks[1], (num_output,), jnp.float32) * 0.01,
        "w2": conv_w(ks[2], num_output, num_output),
        "b2": jax.random.normal(ks[3], (num_output,), jnp.float32) * 0.01,
        "w3": conv_w(ks[4], num_output, num_output),
        "b3": jax.random.normal(ks[5], (num_output,), jnp.float32) * 0.01,
    }


# Pure-JAX reference with matching precision (bf16 conv operands, f32
# accumulation / bias / residual / ReLU) so the comparison stays tight.
def _ref_conv_bf16(x_nhwc, w_hwio, b):
    y = jax.lax.conv_general_dilated(
        x_nhwc.astype(jnp.bfloat16), w_hwio.astype(jnp.bfloat16),
        window_strides=(1, 1), padding="SAME",
        dimension_numbers=("NHWC", "HWIO", "NHWC"),
        preferred_element_type=jnp.float32)
    return y + b.reshape(1, 1, 1, -1)


def _ref_forward(x1, x2, params):
    x = jnp.concatenate([x1, x2], axis=1)
    x = jnp.transpose(x, (0, 2, 3, 1))
    out1 = jax.nn.relu(_ref_conv_bf16(x, params["w1"], params["b1"]))
    out2 = jax.nn.relu(_ref_conv_bf16(out1, params["w2"], params["b2"]))
    out = jax.nn.relu(_ref_conv_bf16(out2, params["w3"], params["b3"]) + out1)
    return jnp.transpose(out, (0, 3, 1, 2))


if __name__ == "__main__":
    key = jax.random.PRNGKey(0)
    k1, k2, kp = jax.random.split(key, 3)

    # batch=2, x1/x2 each 2 channels -> num_input=4, num_output=8, spatial 16x16.
    N, C_half, H, W = 2, 2, 16, 16
    num_input, num_output = 2 * C_half, 8

    x1 = jax.random.normal(k1, (N, C_half, H, W), jnp.float32)
    x2 = jax.random.normal(k2, (N, C_half, H, W), jnp.float32)
    params = init_params(kp, num_input, num_output)

    fwd = jax.jit(binary_module_forward)
    out, saved_map = fwd(x1, x2, params)
    out = jax.block_until_ready(out)
    saved_map = jax.block_until_ready(saved_map)

    assert out.shape == (N, num_output, H, W)
    assert saved_map.shape == (num_output, H, W)

    ref = _ref_forward(x1, x2, params)
    if not jnp.allclose(out, ref, atol=2e-3, rtol=2e-3):
        err = float(jnp.max(jnp.abs(out - ref)))
        raise AssertionError(
            f"Pallas output does not match JAX reference (max abs err {err})")

    print("KERNEL_OK")
</pallas_src>

<mosaic_0001>
module attributes {stable_mosaic.version = 11 : i64} {
  func.func @_fused_resblock_kernel(%arg0: i32, %arg1: memref<1x35x64xf32, #tpu.memory_space<vmem>>, %arg2: memref<3x64x128xbf16, #tpu.memory_space<vmem>>, %arg3: memref<1x128xf32, #tpu.memory_space<vmem>>, %arg4: memref<3x128x128xbf16, #tpu.memory_space<vmem>>, %arg5: memref<1x128xf32, #tpu.memory_space<vmem>>, %arg6: memref<3x128x128xbf16, #tpu.memory_space<vmem>>, %arg7: memref<1x128xf32, #tpu.memory_space<vmem>>, %arg8: memref<2x16x128xf32, #tpu.memory_space<vmem>>, %arg9: memref<35x128xf32, #tpu.memory_space<vmem>>, %arg10: memref<35x128xf32, #tpu.memory_space<vmem>>) attributes {dimension_semantics = [#tpu.dimension_semantics<parallel>], iteration_bounds = array<i64: 1>, scalar_prefetch = 0 : i64, scratch_operands = 2 : i64, tpu.core_type = #tpu.core_type<tc>, window_params = [{transform_indices = @transform_0, window_bounds = array<i64: 1, 35, 64>}, {pipeline_mode = #tpu.pipeline_mode<synchronous>, transform_indices = @transform_1, window_bounds = array<i64: 3, 64, 128>}, {pipeline_mode = #tpu.pipeline_mode<synchronous>, transform_indices = @transform_2, window_bounds = array<i64: 1, 128>}, {pipeline_mode = #tpu.pipeline_mode<synchronous>, transform_indices = @transform_3, window_bounds = array<i64: 3, 128, 128>}, {pipeline_mode = #tpu.pipeline_mode<synchronous>, transform_indices = @transform_4, window_bounds = array<i64: 1, 128>}, {pipeline_mode = #tpu.pipeline_mode<synchronous>, transform_indices = @transform_5, window_bounds = array<i64: 3, 128, 128>}, {pipeline_mode = #tpu.pipeline_mode<synchronous>, transform_indices = @transform_6, window_bounds = array<i64: 1, 128>}, {transform_indices = @transform_7, window_bounds = array<i64: 2, 16, 128>}]} {
    %cst = arith.constant 0.000000e+00 : f32
    %0 = vector.broadcast %cst : f32 to vector<1x128xf32>
    %c0 = arith.constant 0 : index
    %c0_0 = arith.constant 0 : index
    %c0_1 = arith.constant 0 : index
    %1 = vector.load %arg1[%c0, %c0_0, %c0_1] : memref<1x35x64xf32, #tpu.memory_space<vmem>>, vector<1x35x64xf32>
    %2 = vector.shape_cast %1 : vector<1x35x64xf32> to vector<35x64xf32>
    %3 = vector.extract_strided_slice %2 {offsets = [0, 0], sizes = [33, 64], strides = [1, 1]} : vector<35x64xf32> to vector<33x64xf32>
    %4 = arith.truncf %3 : vector<33x64xf32> to vector<33x64xbf16>
    %c0_2 = arith.constant 0 : index
    %c0_3 = arith.constant 0 : index
    %c0_4 = arith.constant 0 : index
    %5 = vector.load %arg2[%c0_2, %c0_3, %c0_4] : memref<3x64x128xbf16, #tpu.memory_space<vmem>>, vector<1x64x128xbf16>
    %6 = vector.shape_cast %5 : vector<1x64x128xbf16> to vector<64x128xbf16>
    %cst_5 = arith.constant dense<0.000000e+00> : vector<33x128xf32>
    %7 = tpu.matmul %4, %6, %cst_5 {dimension_numbers = #tpu.dot_dimension_numbers<[1], [0], [0], [1], [0, 0, 1, 1], [], []>} : vector<33x64xbf16>, vector<64x128xbf16>, vector<33x128xf32> -> vector<33x128xf32>
    %8 = vector.extract_strided_slice %2 {offsets = [1, 0], sizes = [33, 64], strides = [1, 1]} : vector<35x64xf32> to vector<33x64xf32>
    %9 = arith.truncf %8 : vector<33x64xf32> to vector<33x64xbf16>
    %c1 = arith.constant 1 : index
    %c0_6 = arith.constant 0 : index
    %c0_7 = arith.constant 0 : index
    %10 = vector.load %arg2[%c1, %c0_6, %c0_7] : memref<3x64x128xbf16, #tpu.memory_space<vmem>>, vector<1x64x128xbf16>
    %11 = vector.shape_cast %10 : vector<1x64x128xbf16> to vector<64x128xbf16>
    %cst_8 = arith.constant dense<0.000000e+00> : vector<33x128xf32>
    %12 = tpu.matmul %9, %11, %cst_8 {dimension_numbers = #tpu.dot_dimension_numbers<[1], [0], [0], [1], [0, 0, 1, 1], [], []>} : vector<33x64xbf16>, vector<64x128xbf16>, vector<33x128xf32> -> vector<33x128xf32>
    %13 = arith.addf %7, %12 : vector<33x128xf32>
    %14 = vector.extract_strided_slice %2 {offsets = [2, 0], sizes = [33, 64], strides = [1, 1]} : vector<35x64xf32> to vector<33x64xf32>
    %15 = arith.truncf %14 : vector<33x64xf32> to vector<33x64xbf16>
    %c2 = arith.constant 2 : index
    %c0_9 = arith.constant 0 : index
    %c0_10 = arith.constant 0 : index
    %16 = vector.load %arg2[%c2, %c0_9, %c0_10] : memref<3x64x128xbf16, #tpu.memory_space<vmem>>, vector<1x64x128xbf16>
    %17 = vector.shape_cast %16 : vector<1x64x128xbf16> to vector<64x128xbf16>
    %cst_11 = arith.constant dense<0.000000e+00> : vector<33x128xf32>
    %18 = tpu.matmul %15, %17, %cst_11 {dimension_numbers = #tpu.dot_dimension_numbers<[1], [0], [0], [1], [0, 0, 1, 1], [], []>} : vector<33x64xbf16>, vector<64x128xbf16>, vector<33x128xf32> -> vector<33x128xf32>
    %19 = arith.addf %13, %18 : vector<33x128xf32>
    %c0_12 = arith.constant 0 : index
    %c0_13 = arith.constant 0 : index
    %20 = vector.load %arg3[%c0_12, %c0_13] : memref<1x128xf32, #tpu.memory_space<vmem>>, vector<1x128xf32>
    %21 = vector.broadcast %20 : vector<1x128xf32> to vector<33x128xf32>
    %22 = arith.addf %19, %21 : vector<33x128xf32>
    %cst_14 = arith.constant 0.000000e+00 : f32
    %23 = vector.broadcast %cst_14 : f32 to vector<33x128xf32>
    %24 = arith.maximumf %22, %23 : vector<33x128xf32>
    %c1_15 = arith.constant 1 : index
    %c0_16 = arith.constant 0 : index
    %25 = vector.load %arg9[%c1_15, %c0_16] : memref<35x128xf32, #tpu.memory_space<vmem>>, vector<33x128xf32>
    tpu.vector_store %arg9[%c1_15, %c0_16], %24 {strides = array<i32>} : memref<35x128xf32, #tpu.memory_space<vmem>>, vector<33x128xf32>,
    %c0_17 = arith.constant 0 : index
    %c0_18 = arith.constant 0 : index
    %26 = vector.load %arg9[%c0_17, %c0_18] : memref<35x128xf32, #tpu.memory_space<vmem>>, vector<1x128xf32>
    tpu.vector_store %arg9[%c0_17, %c0_18], %0 {strides = array<i32>} : memref<35x128xf32, #tpu.memory_space<vmem>>, vector<1x128xf32>,
    %c34 = arith.constant 34 : index
    %c0_19 = arith.constant 0 : index
    %27 = vector.load %arg9[%c34, %c0_19] : memref<35x128xf32, #tpu.memory_space<vmem>>, vector<1x128xf32>
    tpu.vector_store %arg9[%c34, %c0_19], %0 {strides = array<i32>} : memref<35x128xf32, #tpu.memory_space<vmem>>, vector<1x128xf32>,
    %c17 = arith.constant 17 : index
    %c0_20 = arith.constant 0 : index
    %28 = vector.load %arg9[%c17, %c0_20] : memref<35x128xf32, #tpu.memory_space<vmem>>, vector<1x128xf32>
    tpu.vector_store %arg9[%c17, %c0_20], %0 {strides = array<i32>} : memref<35x128xf32, #tpu.memory_space<vmem>>, vector<1x128xf32>,
    %c0_21 = arith.constant 0 : index
    %c0_22 = arith.constant 0 : index
    %29 = vector.load %arg9[%c0_21, %c0_22] : memref<35x128xf32, #tpu.memory_space<vmem>>, vector<35x128xf32>
    %30 = vector.extract_strided_slice %29 {offsets = [0, 0], sizes = [33, 128], strides = [1, 1]} : vector<35x128xf32> to vector<33x128xf32>
    %31 = arith.truncf %30 : vector<33x128xf32> to vector<33x128xbf16>
    %c0_23 = arith.constant 0 : index
    %c0_24 = arith.constant 0 : index
    %c0_25 = arith.constant 0 : index
    %32 = vector.load %arg4[%c0_23, %c0_24, %c0_25] : memref<3x128x128xbf16, #tpu.memory_space<vmem>>, vector<1x128x128xbf16>
    %33 = vector.shape_cast %32 : vector<1x128x128xbf16> to vector<128x128xbf16>
    %cst_26 = arith.constant dense<0.000000e+00> : vector<33x128xf32>
    %34 = tpu.matmul %31, %33, %cst_26 {dimension_numbers = #tpu.dot_dimension_numbers<[1], [0], [0], [1], [0, 0, 1, 1], [], []>} : vector<33x128xbf16>, vector<128x128xbf16>, vector<33x128xf32> -> vector<33x128xf32>
    %35 = vector.extract_strided_slice %29 {offsets = [1, 0], sizes = [33, 128], strides = [1, 1]} : vector<35x128xf32> to vector<33x128xf32>
    %36 = arith.truncf %35 : vector<33x128xf32> to vector<33x128xbf16>
    %c1_27 = arith.constant 1 : index
    %c0_28 = arith.constant 0 : index
    %c0_29 = arith.constant 0 : index
    %37 = vector.load %arg4[%c1_27, %c0_28, %c0_29] : memref<3x128x128xbf16, #tpu.memory_space<vmem>>, vector<1x128x128xbf16>
    %38 = vector.shape_cast %37 : vector<1x128x128xbf16> to vector<128x128xbf16>
    %cst_30 = arith.constant dense<0.000000e+00> : vector<33x128xf32>
    %39 = tpu.matmul %36, %38, %cst_30 {dimension_numbers = #tpu.dot_dimension_numbers<[1], [0], [0], [1], [0, 0, 1, 1], [], []>} : vector<33x128xbf16>, vector<128x128xbf16>, vector<33x128xf32> -> vector<33x128xf32>
    %40 = arith.addf %34, %39 : vector<33x128xf32>
    %41 = vector.extract_strided_slice %29 {offsets = [2, 0], sizes = [33, 128], strides = [1, 1]} : vector<35x128xf32> to vector<33x128xf32>
    %42 = arith.truncf %41 : vector<33x128xf32> to vector<33x128xbf16>
    %c2_31 = arith.constant 2 : index
    %c0_32 = arith.constant 0 : index
    %c0_33 = arith.constant 0 : index
    %43 = vector.load %arg4[%c2_31, %c0_32, %c0_33] : memref<3x128x128xbf16, #tpu.memory_space<vmem>>, vector<1x128x128xbf16>
    %44 = vector.shape_cast %43 : vector<1x128x128xbf16> to vector<128x128xbf16>
    %cst_34 = arith.constant dense<0.000000e+00> : vector<33x128xf32>
    %45 = tpu.matmul %42, %44, %cst_34 {dimension_numbers = #tpu.dot_dimension_numbers<[1], [0], [0], [1], [0, 0, 1, 1], [], []>} : vector<33x128xbf16>, vector<128x128xbf16>, vector<33x128xf32> -> vector<33x128xf32>
    %46 = arith.addf %40, %45 : vector<33x128xf32>
    %c0_35 = arith.constant 0 : index
    %c0_36 = arith.constant 0 : index
    %47 = vector.load %arg5[%c0_35, %c0_36] : memref<1x128xf32, #tpu.memory_space<vmem>>, vector<1x128xf32>
    %48 = vector.broadcast %47 : vector<1x128xf32> to vector<33x128xf32>
    %49 = arith.addf %46, %48 : vector<33x128xf32>
    %cst_37 = arith.constant 0.000000e+00 : f32
    %50 = vector.broadcast %cst_37 : f32 to vector<33x128xf32>
    %51 = arith.maximumf %49, %50 : vector<33x128xf32>
    %c1_38 = arith.constant 1 : index
    %c0_39 = arith.constant 0 : index
    %52 = vector.load %arg10[%c1_38, %c0_39] : memref<35x128xf32, #tpu.memory_space<vmem>>, vector<33x128xf32>
    tpu.vector_store %arg10[%c1_38, %c0_39], %51 {strides = array<i32>} : memref<35x128xf32, #tpu.memory_space<vmem>>, vector<33x128xf32>,
    %c0_40 = arith.constant 0 : index
    %c0_41 = arith.constant 0 : index
    %53 = vector.load %arg10[%c0_40, %c0_41] : memref<35x128xf32, #tpu.memory_space<vmem>>, vector<1x128xf32>
    tpu.vector_store %arg10[%c0_40, %c0_41], %0 {strides = array<i32>} : memref<35x128xf32, #tpu.memory_space<vmem>>, vector<1x128xf32>,
    %c34_42 = arith.constant 34 : index
    %c0_43 = arith.constant 0 : index
    %54 = vector.load %arg10[%c34_42, %c0_43] : memref<35x128xf32, #tpu.memory_space<vmem>>, vector<1x128xf32>
    tpu.vector_store %arg10[%c34_42, %c0_43], %0 {strides = array<i32>} : memref<35x128xf32, #tpu.memory_space<vmem>>, vector<1x128xf32>,
    %c17_44 = arith.constant 17 : index
    %c0_45 = arith.constant 0 : index
    %55 = vector.load %arg10[%c17_44, %c0_45] : memref<35x128xf32, #tpu.memory_space<vmem>>, vector<1x128xf32>
    tpu.vector_store %arg10[%c17_44, %c0_45], %0 {strides = array<i32>} : memref<35x128xf32, #tpu.memory_space<vmem>>, vector<1x128xf32>,
    %c0_46 = arith.constant 0 : index
    %c0_47 = arith.constant 0 : index
    %56 = vector.load %arg10[%c0_46, %c0_47] : memref<35x128xf32, #tpu.memory_space<vmem>>, vector<35x128xf32>
    %57 = vector.extract_strided_slice %56 {offsets = [0, 0], sizes = [33, 128], strides = [1, 1]} : vector<35x128xf32> to vector<33x128xf32>
    %58 = arith.truncf %57 : vector<33x128xf32> to vector<33x128xbf16>
    %c0_48 = arith.constant 0 : index
    %c0_49 = arith.constant 0 : index
    %c0_50 = arith.constant 0 : index
    %59 = vector.load %arg6[%c0_48, %c0_49, %c0_50] : memref<3x128x128xbf16, #tpu.memory_space<vmem>>, vector<1x128x128xbf16>
    %60 = vector.shape_cast %59 : vector<1x128x128xbf16> to vector<128x128xbf16>
    %cst_51 = arith.constant dense<0.000000e+00> : vector<33x128xf32>
    %61 = tpu.matmul %58, %60, %cst_51 {dimension_numbers = #tpu.dot_dimension_numbers<[1], [0], [0], [1], [0, 0, 1, 1], [], []>} : vector<33x128xbf16>, vector<128x128xbf16>, vector<33x128xf32> -> vector<33x128xf32>
    %62 = vector.extract_strided_slice %56 {offsets = [1, 0], sizes = [33, 128], strides = [1, 1]} : vector<35x128xf32> to vector<33x128xf32>
    %63 = arith.truncf %62 : vector<33x128xf32> to vector<33x128xbf16>
    %c1_52 = arith.constant 1 : index
    %c0_53 = arith.constant 0 : index
    %c0_54 = arith.constant 0 : index
    %64 = vector.load %arg6[%c1_52, %c0_53, %c0_54] : memref<3x128x128xbf16, #tpu.memory_space<vmem>>, vector<1x128x128xbf16>
    %65 = vector.shape_cast %64 : vector<1x128x128xbf16> to vector<128x128xbf16>
    %cst_55 = arith.constant dense<0.000000e+00> : vector<33x128xf32>
    %66 = tpu.matmul %63, %65, %cst_55 {dimension_numbers = #tpu.dot_dimension_numbers<[1], [0], [0], [1], [0, 0, 1, 1], [], []>} : vector<33x128xbf16>, vector<128x128xbf16>, vector<33x128xf32> -> vector<33x128xf32>
    %67 = arith.addf %61, %66 : vector<33x128xf32>
    %68 = vector.extract_strided_slice %56 {offsets = [2, 0], sizes = [33, 128], strides = [1, 1]} : vector<35x128xf32> to vector<33x128xf32>
    %69 = arith.truncf %68 : vector<33x128xf32> to vector<33x128xbf16>
    %c2_56 = arith.constant 2 : index
    %c0_57 = arith.constant 0 : index
    %c0_58 = arith.constant 0 : index
    %70 = vector.load %arg6[%c2_56, %c0_57, %c0_58] : memref<3x128x128xbf16, #tpu.memory_space<vmem>>, vector<1x128x128xbf16>
    %71 = vector.shape_cast %70 : vector<1x128x128xbf16> to vector<128x128xbf16>
    %cst_59 = arith.constant dense<0.000000e+00> : vector<33x128xf32>
    %72 = tpu.matmul %69, %71, %cst_59 {dimension_numbers = #tpu.dot_dimension_numbers<[1], [0], [0], [1], [0, 0, 1, 1], [], []>} : vector<33x128xbf16>, vector<128x128xbf16>, vector<33x128xf32> -> vector<33x128xf32>
    %73 = arith.addf %67, %72 : vector<33x128xf32>
    %c0_60 = arith.constant 0 : index
    %c0_61 = arith.constant 0 : index
    %74 = vector.load %arg7[%c0_60, %c0_61] : memref<1x128xf32, #tpu.memory_space<vmem>>, vector<1x128xf32>
    %75 = vector.broadcast %74 : vector<1x128xf32> to vector<33x128xf32>
    %76 = arith.addf %73, %75 : vector<33x128xf32>
    %77 = arith.addf %76, %24 : vector<33x128xf32>
    %cst_62 = arith.constant 0.000000e+00 : f32
    %78 = vector.broadcast %cst_62 : f32 to vector<33x128xf32>
    %79 = arith.maximumf %77, %78 : vector<33x128xf32>
    %80 = vector.extract_strided_slice %79 {offsets = [0, 0], sizes = [16, 128], strides = [1, 1]} : vector<33x128xf32> to vector<16x128xf32>
    %c0_63 = arith.constant 0 : index
    %c0_64 = arith.constant 0 : index
    %c0_65 = arith.constant 0 : index
    %81 = vector.load %arg8[%c0_63, %c0_64, %c0_65] : memref<2x16x128xf32, #tpu.memory_space<vmem>>, vector<1x16x128xf32>
    %82 = vector.shape_cast %81 : vector<1x16x128xf32> to vector<16x128xf32>
    %83 = vector.shape_cast %80 : vector<16x128xf32> to vector<1x16x128xf32>
    tpu.vector_store %arg8[%c0_63, %c0_64, %c0_65], %83 {strides = array<i32>} : memref<2x16x128xf32, #tpu.memory_space<vmem>>, vector<1x16x128xf32>,
    %84 = vector.extract_strided_slice %79 {offsets = [17, 0], sizes = [16, 128], strides = [1, 1]} : vector<33x128xf32> to vector<16x128xf32>
    %c1_66 = arith.constant 1 : index
    %c0_67 = arith.constant 0 : index
    %c0_68 = arith.constant 0 : index
    %85 = vector.load %arg8[%c1_66, %c0_67, %c0_68] : memref<2x16x128xf32, #tpu.memory_space<vmem>>, vector<1x16x128xf32>
    %86 = vector.shape_cast %85 : vector<1x16x128xf32> to vector<16x128xf32>
    %87 = vector.shape_cast %84 : vector<16x128xf32> to vector<1x16x128xf32>
    tpu.vector_store %arg8[%c1_66, %c0_67, %c0_68], %87 {strides = array<i32>} : memref<2x16x128xf32, #tpu.memory_space<vmem>>, vector<1x16x128xf32>,
    return
  }
  func.func @transform_0(%arg0: i32) -> (i32, i32, i32) {
    %c0_i32 = arith.constant 0 : i32
    %c0_i32_0 = arith.constant 0 : i32
    %c0_i32_1 = arith.constant 0 : i32
    return %arg0, %c0_i32, %c0_i32_0 : i32, i32, i32
  }
  func.func @transform_1(%arg0: i32) -> (i32, i32, i32) {
    %c0_i32 = arith.constant 0 : i32
    %c0_i32_0 = arith.constant 0 : i32
    %c0_i32_1 = arith.constant 0 : i32
    %c0_i32_2 = arith.constant 0 : i32
    return %c0_i32, %c0_i32_0, %c0_i32_1 : i32, i32, i32
  }
  func.func @transform_2(%arg0: i32) -> (i32, i32) {
    %c0_i32 = arith.constant 0 : i32
    %c0_i32_0 = arith.constant 0 : i32
    %c0_i32_1 = arith.constant 0 : i32
    return %c0_i32, %c0_i32_0 : i32, i32
  }
  func.func @transform_3(%arg0: i32) -> (i32, i32, i32) {
    %c0_i32 = arith.constant 0 : i32
    %c0_i32_0 = arith.constant 0 : i32
    %c0_i32_1 = arith.constant 0 : i32
    %c0_i32_2 = arith.constant 0 : i32
    return %c0_i32, %c0_i32_0, %c0_i32_1 : i32, i32, i32
  }
  func.func @transform_4(%arg0: i32) -> (i32, i32) {
    %c0_i32 = arith.constant 0 : i32
    %c0_i32_0 = arith.constant 0 : i32
    %c0_i32_1 = arith.constant 0 : i32
    return %c0_i32, %c0_i32_0 : i32, i32
  }
  func.func @transform_5(%arg0: i32) -> (i32, i32, i32) {
    %c0_i32 = arith.constant 0 : i32
    %c0_i32_0 = arith.constant 0 : i32
    %c0_i32_1 = arith.constant 0 : i32
    %c0_i32_2 = arith.constant 0 : i32
    return %c0_i32, %c0_i32_0, %c0_i32_1 : i32, i32, i32
  }
  func.func @transform_6(%arg0: i32) -> (i32, i32) {
    %c0_i32 = arith.constant 0 : i32
    %c0_i32_0 = arith.constant 0 : i32
    %c0_i32_1 = arith.constant 0 : i32
    return %c0_i32, %c0_i32_0 : i32, i32
  }
  func.func @transform_7(%arg0: i32) -> (i32, i32, i32) {
    %c0_i32 = arith.constant 0 : i32
    %c0_i32_0 = arith.constant 0 : i32
    %c0_i32_1 = arith.constant 0 : i32
    return %arg0, %c0_i32, %c0_i32_0 : i32, i32, i32
  }
}

</mosaic_0001>

<bundles_post_ra>
// kernel: tile.18
= control target key start
LH: loop header
LB: loop body
LE: loop exit
PB: predicated region body
PF: predicated region fallthrough
CT: control target
= control target key end

     0   :  { %s28_s0 = inlined_call_operand.vmem [shape: f32[8], index: 0, kind: input, shape index: {}]   ;;  %s29_s1 = inlined_call_operand.vmem [shape: f32[16,8], index: 1, kind: output, shape index: {}]  }
   0x1   :  { %v4_v0 = vld [vmem:[%s28_s0] ss:$0 sm:$0xff] }
   0x2   :  { %5 = vst [vmem:[%s29_s1] sm:$0xff] %v4_v0  ;;  %8 = vst [vmem:[%s29_s1 + $0x8] sm:$0xff] %v4_v0 }

// kernel: tile.19
= control target key start
LH: loop header
LB: loop body
LE: loop exit
PB: predicated region body
PF: predicated region fallthrough
CT: control target
= control target key end

     0   :  { %s131_s10 = smov 120   ;;  %s132_s11 = smov 104   ;;  %vm3_vm0 = vcmask 64512   ;;  %vm9_vm1 = vcmask 1048512   ;;  %vm15_vm2 = vcmask 982912   ;;  %vm21_vm3 = vcmask 917312   ;;  %s207_s0 = inlined_call_operand.vmem [shape: f32[16,8], index: 0, kind: input, shape index: {}]   ;;  %s208_s1 = inlined_call_operand.vmem [shape: f32[1,128], index: 1, kind: output, shape index: {}]  }
   0x1   :  { %v101_v0 = vld [vmem:[%s207_s0 + $0xf] sm:$0x1]   ;;  %v103_v1 = vld [vmem:[%s207_s0 + $0xd] sm:$0x1]   ;;  %v102_v2 = vld [vmem:[%s207_s0 + $0xe] sm:$0x1]  }
   0x2   :  { %7 = vrot.lane.b32.xlu0 %v101_v0, %s131_s10  ;;  %19 = vrot.lane.b32.xlu1 %v103_v1, %s132_s11  ;;  %v104_v3 = vld [vmem:[%s207_s0 + $0xc] sm:$0x1]   ;;  %s133_s16 = smov 112   ;;  %s134_s17 = smov 96   ;;  %v105_v4 = vld [vmem:[%s207_s0 + $0xb] sm:$0x1]  }
   0x3   :  { %v106_v5 = vld [vmem:[%s207_s0 + $0xa] sm:$0x1]   ;;  %v2_v6 = vld [vmem:[%s207_s0] sm:$0x1]   ;;  %s135_s24 = smov 88   ;;  %s136_s25 = smov 80  }
   0x4   :  { %4 = vst.msk [vmem:[#allocation0] sm:$0x1] %vm3_vm0, %v2_v6   ;;  %v107_v7 = vld [vmem:[%s207_s0 + $0x9] sm:$0x1]   ;;  %v108_v8 = vld [vmem:[%s207_s0 + $0x8] sm:$0x1]  }
   0x5   :  { %s137_s30 = smov 72   ;;  %s138_s2 = smov 64   ;;  %v109_v9 = vld [vmem:[%s207_s0 + $0x7] sm:$0x1]   ;;  %v110_v10 = vld [vmem:[%s207_s0 + $0x6] sm:$0x1]  }
   0x6   :  { %13 = vrot.lane.b32.xlu0 %v102_v2, %s133_s16  ;;  %25 = vrot.lane.b32.xlu1 %v104_v3, %s134_s17  ;;  %s139_s7 = smov 56   ;;  %s140_s8 = smov 48   ;;  %v111_v11 = vld [vmem:[%s207_s0 + $0x5] sm:$0x1]   ;;  %v112_v12 = vld [vmem:[%s207_s0 + $0x4] sm:$0x1]  }
   0x7   :  { %s141_s13 = smov 40   ;;  %s142_s14 = smov 32   ;;  %v113_v13 = vld [vmem:[%s207_s0 + $0x3] sm:$0x1]   ;;  %v114_v14 = vld [vmem:[%s207_s0 + $0x2] sm:$0x1]  }
   0x8   :  { %s143_s19 = smov 24   ;;  %s144_s20 = smov 16   ;;  %v115_v15 = vld [vmem:[%s207_s0 + $0x1] sm:$0x1]   ;;  %vm27_vm4 = vcmask 851712   ;;  %vm33_vm5 = vcmask 786112  }
   0x9   :  { %s145_s0 = smov 8   ;;  %vm39_vm6 = vcmask 720512   ;;  %vm45_vm7 = vcmask 654912   ;;  %vm51_vm8 = vcmask 589312   ;;  %vm57_vm9 = vcmask 523712  }
   0xa   :  { %31 = vrot.lane.b32.xlu0 %v105_v4, %s135_s24  ;;  %37 = vrot.lane.b32.xlu1 %v106_v5, %s136_s25  ;;  %vm63_vm10 = vcmask 458112   ;;  %vm69_vm11 = vcmask 392512   ;;  %vm75_vm12 = vcmask 326912   ;;  %vm81_vm13 = vcmask 261312  }
   0xb   :  { %vm87_vm14 = vcmask 195712   ;;  %vm93_vm15 = vcmask 130112  }
   0xe   :  { %43 = vrot.lane.b32.xlu0 %v107_v7, %s137_s30  ;;  %49 = vrot.lane.b32.xlu1 %v108_v8, %s138_s2 }
  0x12   :  { %55 = vrot.lane.b32.xlu0 %v109_v9, %s139_s7  ;;  %61 = vrot.lane.b32.xlu1 %v110_v10, %s140_s8 }
  0x16   :  { %67 = vrot.lane.b32.xlu0 %v111_v11, %s141_s13  ;;  %73 = vrot.lane.b32.xlu1 %v112_v12, %s142_s14 }
  0x1a   :  { %79 = vrot.lane.b32.xlu0 %v113_v13, %s143_s19  ;;  %85 = vrot.lane.b32.xlu1 %v114_v14, %s144_s20 }
  0x1e   :  { %91 = vrot.lane.b32.xlu0 %v115_v15, %s145_s0 }
  0x74   :  { %v8_v16 = vpop.permute.xlu0 %7   ;;  %v20_v17 = vpop.permute.xlu1 %19  }
  0x75   :  { %10 = vst.msk [vmem:[#allocation0] sm:$0x1] %vm9_vm1, %v8_v16  }
  0x78   :  { %v14_v18 = vpop.permute.xlu0 %13   ;;  %v26_v19 = vpop.permute.xlu1 %25  }
  0x79   :  { %16 = vst.msk [vmem:[#allocation0] sm:$0x1] %vm15_vm2, %v14_v18  }
  0x7a   :  { %22 = vst.msk [vmem:[#allocation0] sm:$0x1] %vm21_vm3, %v20_v17  }
  0x7b   :  { %28 = vst.msk [vmem:[#allocation0] sm:$0x1] %vm27_vm4, %v26_v19  }
  0x7c   :  { %v32_v20 = vpop.permute.xlu0 %31   ;;  %v38_v21 = vpop.permute.xlu1 %37  }
  0x7d   :  { %34 = vst.msk [vmem:[#allocation0] sm:$0x1] %vm33_vm5, %v32_v20  }
  0x7e   :  { %40 = vst.msk [vmem:[#allocation0] sm:$0x1] %vm39_vm6, %v38_v21  }
  0x80   :  { %v44_v22 = vpop.permute.xlu0 %43   ;;  %v50_v23 = vpop.permute.xlu1 %49  }
  0x81   :  { %46 = vst.msk [vmem:[#allocation0] sm:$0x1] %vm45_vm7, %v44_v22  }
  0x82   :  { %52 = vst.msk [vmem:[#allocation0] sm:$0x1] %vm51_vm8, %v50_v23  }
  0x84   :  { %v56_v24 = vpop.permute.xlu0 %55   ;;  %v62_v25 = vpop.permute.xlu1 %61  }
  0x85   :  { %58 = vst.msk [vmem:[#allocation0] sm:$0x1] %vm57_vm9, %v56_v24  }
  0x86   :  { %64 = vst.msk [vmem:[#allocation0] sm:$0x1] %vm63_vm10, %v62_v25  }
  0x88   :  { %v68_v26 = vpop.permute.xlu0 %67   ;;  %v74_v27 = vpop.permute.xlu1 %73  }
  0x89   :  { %70 = vst.msk [vmem:[#allocation0] sm:$0x1] %vm69_vm11, %v68_v26  }
  0x8a   :  { %76 = vst.msk [vmem:[#allocation0] sm:$0x1] %vm75_vm12, %v74_v27  }
  0x8c   :  { %v80_v28 = vpop.permute.xlu0 %79   ;;  %v86_v29 = vpop.permute.xlu1 %85  }
  0x8d   :  { %82 = vst.msk [vmem:[#allocation0] sm:$0x1] %vm81_vm13, %v80_v28  }
  0x8e   :  { %88 = vst.msk [vmem:[#allocation0] sm:$0x1] %vm87_vm14, %v86_v29  }
  0x90   :  { %v92_v30 = vpop.permute.xlu0 %91  }
  0x91   :  { %94 = vst.msk [vmem:[#allocation0] sm:$0x1] %vm93_vm15, %v92_v30  }
  0x98   :  { %v98_v31 = vld [vmem:[#allocation0] sm:$0x1] }
  0x99   :  { %100 = vst [vmem:[%s208_s1] sm:$0x1] %v98_v31 }

// kernel: binary_module_forward.1
= control target key start
LH: loop header
LB: loop body
LE: loop exit
PB: predicated region body
PF: predicated region fallthrough
CT: control target
= control target key end

     0   :  { %v1807_v0 = vmov 0.0   ;;  %vm1808_vm0 = vmmov 0   ;;  %vm52_vm1 = vsmask.f32 7424  ;;  %vm99_vm2 = vcmask 523264   ;;  %s2272_s1 = inlined_call_operand.vmem [shape: bf16[3,64,128], index: 1, kind: input, shape index: {}]   ;;  %s2273_s0 = inlined_call_operand.vmem [shape: f32[1,35,64], index: 0, kind: input, shape index: {}]   ;;  %s2274_s3 = inlined_call_operand.vmem [shape: bf16[3,128,128], index: 3, kind: input, shape index: {}]   ;;  %s2275_s2 = inlined_call_operand.vmem [shape: f32[1,128], index: 2, kind: input, shape index: {}]   ;;  %s2276_s5 = inlined_call_operand.vmem [shape: bf16[3,128,128], index: 5, kind: input, shape index: {}]   ;;  %s2277_s4 = inlined_call_operand.vmem [shape: f32[1,128], index: 4, kind: input, shape index: {}]   ;;  %s2278_s6 = inlined_call_operand.vmem [shape: f32[1,128], index: 6, kind: input, shape index: {}]   ;;  %s2279_s7 = inlined_call_operand.vmem [shape: f32[2,16,128], index: 7, kind: output, shape index: {}]  }
   0x1   :  { %1509 = vmatprep.subr.bf16.mxu0 %v1807_v0  ;;  %385 = vst [vmem:[#allocation2] sm:$0x1] %v1807_v0  ;;  %386 = vst [vmem:[#allocation2 + $0x22] sm:$0x1] %v1807_v0  ;;  %1737 = vmatprep.subr.bf16.mxu1 %v1807_v0  ;;  %v1747_v1 = vld [vmem:[%s2272_s1 + $0x20] sm:$0xff]   ;;  %v1748_v2 = vld [vmem:[%s2272_s1 + $0x28] sm:$0xff]  }
   0x2   :  { %821 = vst [vmem:[#allocation3] sm:$0x1] %v1807_v0  ;;  %822 = vst [vmem:[#allocation3 + $0x22] sm:$0x1] %v1807_v0  ;;  %1517 = vmatprep.mubr.msk.bf16.mxu0 %vm1808_vm0, %v1807_v0  ;;  %1525 = vmatprep.mubr.msk.bf16.mxu1 %vm1808_vm0, %v1807_v0  ;;  %v27_v3 = vld [vmem:[%s2273_s0] sm:$0xff]  ;;  %v28_v4 = vld [vmem:[%s2273_s0 + $0x8] sm:$0xff] }
   0x3   :  { %1510 = vmatpush3.bf16.msra.mxu0 %v1747_v1  ;;  %1741 = vmatpush3.bf16.msra.mxu1 %v1747_v1  ;;  %v29_v5 = vld [vmem:[%s2273_s0 + $0x10] sm:$0xff]  ;;  %v30_v7 = vld [vmem:[%s2273_s0 + $0x18] sm:$0xff]  ;;  %v1882_v8 = vpack.c.bf16 %v28_v4, %v27_v3  ;;  %v31_v10 = vld [vmem:[%s2273_s0 + $0x20] sm:$0x7]  ;;  %vm263_vm3 = vcmask 1046528  }
   0x4   :  { %1511 = vmatprep.subr.bf16.mxu0 %v1807_v0  ;;  %1738 = vmatprep.subr.bf16.mxu1 %v1807_v0  ;;  %v1749_v6 = vld [vmem:[%s2272_s1 + $0x30] sm:$0xff]   ;;  %v1884_v9 = vpack.c.bf16 %v30_v7, %v29_v5  ;;  %v1894_v15 = vpack.c.bf16 %v31_v10, %v31_v10  ;;  %v1750_v16 = vld [vmem:[%s2272_s1 + $0x38] sm:$0xff]   ;;  %v1751_v21 = vld [vmem:[%s2272_s1] sm:$0xff]  }
   0x5   :  { %v54_v11 = vshrl.u32 %v1882_v8, 16  ;;  %v56_v12 = vshll.u32 %v1882_v8, 16  ;;  %v1752_v22 = vld [vmem:[%s2272_s1 + $0x40] sm:$0xff]   ;;  %v1753_v25 = vld [vmem:[%s2272_s1 + $0x8] sm:$0xff]   ;;  %v1755_v30 = vld [vmem:[%s2272_s1 + $0x10] sm:$0xff]   ;;  %v264_v34 = vrot.slane %v1882_v8, 1 }
   0x6   :  { %v61_v13 = vshll.u32 %v1884_v9, 16  ;;  %v73_v19 = vshrl.u32 %v1894_v15, 16  ;;  %v65_v23 = vshrl.u32 %v1884_v9, 16  ;;  %v69_v24 = vshll.u32 %v1894_v15, 16  ;;  %v1754_v26 = vld [vmem:[%s2272_s1 + $0x48] sm:$0xff]   ;;  %v1756_v31 = vld [vmem:[%s2272_s1 + $0x50] sm:$0xff]  }
   0x7   :  { %1512 = vmatpush3.bf16.msra.mxu0 %v1748_v2  ;;  %1742 = vmatpush3.bf16.msra.mxu1 %v1748_v2  ;;  %v58_v14 = vrot.slane %v56_v12, 1  ;;  %v1757_v32 = vld [vmem:[%s2272_s1 + $0x18] sm:$0xff]   ;;  %v265_v35 = vrot.slane %v1884_v9, 1  ;;  %v267_v37 = vrot.slane %v1894_v15, 1  ;;  %v1759_v39 = vld [vmem:[%s2274_s3] sm:$0xff]   ;;  %v1760_v40 = vld [vmem:[%s2274_s3 + $0x8] sm:$0xff]  }
   0x8   :  { %1513 = vmatprep.subr.bf16.mxu0 %v1807_v0  ;;  %1739 = vmatprep.subr.bf16.mxu1 %v1807_v0  ;;  %v63_v17 = vrot.slane %v61_v13, 1  ;;  %v71_v28 = vrot.slane %v69_v24, 1  ;;  %v1758_v33 = vld [vmem:[%s2272_s1 + $0x58] sm:$0xff]   ;;  %v1761_v41 = vld [vmem:[%s2274_s3 + $0x10] sm:$0xff]   ;;  %v1762_v42 = vld [vmem:[%s2274_s3 + $0x40] sm:$0xff]  }
   0x9   :  { %v59_v18 = vor.u32 %v58_v14, %v54_v11  ;;  %v266_v36 = vsel %vm263_vm3, %v264_v34, %v265_v35  ;;  %v268_v38 = vsel %vm263_vm3, %v265_v35, %v267_v37  ;;  %v1763_v43 = vld [vmem:[%s2274_s3 + $0x18] sm:$0xff]   ;;  %v1764_v44 = vld [vmem:[%s2274_s3 + $0x48] sm:$0xff]   ;;  %v1765_v45 = vld [vmem:[%s2274_s3 + $0x20] sm:$0xff]  }
   0xa   :  { %v67_v27 = vor.u32 %v65_v23, %v63_v17  ;;  %v1766_v46 = vld [vmem:[%s2274_s3 + $0x50] sm:$0xff]   ;;  %v1767_v47 = vld [vmem:[%s2274_s3 + $0x28] sm:$0xff]   ;;  %v1768_v48 = vld [vmem:[%s2274_s3 + $0x58] sm:$0xff]  }
   0xb   :  { %1514 = vmatpush3.bf16.msra.mxu0 %v1749_v6  ;;  %1743 = vmatpush3.bf16.msra.mxu1 %v1749_v6  ;;  %v64_v20 = vsel %vm52_vm1, %v59_v18, %v63_v17  ;;  %v1769_v49 = vld [vmem:[%s2274_s3 + $0x30] sm:$0xff]   ;;  %v1770_v50 = vld [vmem:[%s2274_s3 + $0x60] sm:$0xff]   ;;  %v1771_v51 = vld [vmem:[%s2274_s3 + $0x38] sm:$0xff]  }
   0xc   :  { %1515 = vmatprep.subr.bf16.mxu0 %v1807_v0  ;;  %1740 = vmatprep.subr.bf16.mxu1 %v1807_v0  ;;  %v72_v29 = vsel %vm52_vm1, %v67_v27, %v71_v28  ;;  %v1772_v52 = vld [vmem:[%s2274_s3 + $0x68] sm:$0xff]   ;;  %v1773_v53 = vld [vmem:[%s2274_s3 + $0x70] sm:$0xff]   ;;  %v1774_v54 = vld [vmem:[%s2274_s3 + $0x78] sm:$0xff]  }
   0xf   :  { %1516 = vmatpush3.bf16.msra.mxu0 %v1750_v16  ;;  %1744 = vmatpush3.bf16.msra.mxu1 %v1750_v16 }
  0x10   :  { %1529 = vmatprep.subr.bf16.mxu1 %v1807_v0  ;;  %1549 = vmatprep.subr.bf16.mxu0 %v1807_v0 }
  0x12   :  { %1518 = vmatmul.mubr.msk.bf16.vlgmr.msra.gmra.mrb[0].mxu0 %vm99_vm2, %v64_v20  ;;  %1526 = vmatmul.mubr.msk.bf16.vlgmr.msra.gmra.mrb[0].mxu1 %vm99_vm2, %v73_v19 }
  0x13   :  { %1530 = vmatpush3.bf16.msra.mxu1 %v1751_v21  ;;  %1550 = vmatpush3.bf16.msra.mxu0 %v1752_v22 }
  0x14   :  { %1531 = vmatprep.subr.bf16.mxu1 %v1807_v0  ;;  %1551 = vmatprep.subr.bf16.mxu0 %v1807_v0 }
  0x15   :  { %1521 = vmatprep.mubr.msk.bf16.mxu0 %vm1808_vm0, %v1807_v0  ;;  %1537 = vmatprep.mubr.msk.bf16.mxu1 %vm1808_vm0, %v1807_v0 }
  0x17   :  { %1532 = vmatpush3.bf16.msra.mxu1 %v1753_v25  ;;  %1552 = vmatpush3.bf16.msra.mxu0 %v1754_v26 }
  0x18   :  { %1533 = vmatprep.subr.bf16.mxu1 %v1807_v0  ;;  %1553 = vmatprep.subr.bf16.mxu0 %v1807_v0 }
  0x1a   :  { %1522 = vmatmul.mubr.msk.bf16.gmra.mrb[4].mxu0 %vm99_vm2, %v72_v29 }
  0x1b   :  { %1534 = vmatpush3.bf16.msra.mxu1 %v1755_v30  ;;  %1554 = vmatpush3.bf16.msra.mxu0 %v1756_v31 }
  0x1c   :  { %1535 = vmatprep.subr.bf16.mxu1 %v1807_v0  ;;  %1555 = vmatprep.subr.bf16.mxu0 %v1807_v0 }
  0x1d   :  { %1557 = vmatprep.mubr.msk.bf16.mxu0 %vm1808_vm0, %v1807_v0 }
  0x1f   :  { %1536 = vmatpush3.bf16.msra.mxu1 %v1757_v32  ;;  %1556 = vmatpush3.bf16.msra.mxu0 %v1758_v33 }
  0x20   :  { %1597 = vmatprep.subr.bf16.mxu0 %v1807_v0  ;;  %1569 = vmatprep.subr.bf16.mxu1 %v1807_v0 }
  0x22   :  { %1538 = vmatmul.mubr.msk.bf16.vlgmr.msra.gmra.mrb[4].mxu1 %vm99_vm2, %v1882_v8  ;;  %1558 = vmatmul.mubr.msk.bf16.vlgmr.msra.gmra.mrb[8].mxu0 %vm99_vm2, %v266_v36 }
  0x23   :  { %1541 = vmatprep.mubr.msk.bf16.mxu1 %vm1808_vm0, %v1807_v0  ;;  %1561 = vmatprep.mubr.msk.bf16.mxu0 %vm1808_vm0, %v1807_v0 }
  0x24   :  { %1598 = vmatpush3.bf16.msra.mxu0 %v1759_v39  ;;  %1570 = vmatpush3.bf16.msra.mxu1 %v1762_v42 }
  0x25   :  { %1599 = vmatprep.subr.bf16.mxu0 %v1807_v0  ;;  %1571 = vmatprep.subr.bf16.mxu1 %v1807_v0 }
  0x28   :  { %1600 = vmatpush3.bf16.msra.mxu0 %v1760_v40  ;;  %1572 = vmatpush3.bf16.msra.mxu1 %v1764_v44 }
  0x29   :  { %1601 = vmatprep.subr.bf16.mxu0 %v1807_v0  ;;  %1573 = vmatprep.subr.bf16.mxu1 %v1807_v0 }
  0x2a   :  { %1542 = vmatmul.mubr.msk.bf16.gmra.mrb[8].mxu1 %vm99_vm2, %v1884_v9  ;;  %1562 = vmatmul.mubr.msk.bf16.gmra.mrb[12].mxu0 %vm99_vm2, %v268_v38  ;;  %v1304_v9 = vld [vmem:[%s2275_s2] ss:$0 sm:$0xff] }
  0x2b   :  { %1545 = vmatprep.mubr.msk.bf16.mxu1 %vm1808_vm0, %v1807_v0  ;;  %1565 = vmatprep.mubr.msk.bf16.mxu0 %vm1808_vm0, %v1807_v0 }
  0x2c   :  { %1602 = vmatpush3.bf16.msra.mxu0 %v1761_v41  ;;  %1574 = vmatpush3.bf16.msra.mxu1 %v1766_v46 }
  0x2d   :  { %1603 = vmatprep.subr.bf16.mxu0 %v1807_v0  ;;  %1575 = vmatprep.subr.bf16.mxu1 %v1807_v0 }
  0x30   :  { %1604 = vmatpush3.bf16.msra.mxu0 %v1763_v43  ;;  %1576 = vmatpush3.bf16.msra.mxu1 %v1768_v48 }
  0x31   :  { %1605 = vmatprep.subr.bf16.mxu0 %v1807_v0  ;;  %1577 = vmatprep.subr.bf16.mxu1 %v1807_v0 }
  0x32   :  { %1546 = vmatmul.mubr.msk.bf16.gmra.mrb[12].mxu1 %vm99_vm2, %v1894_v15  ;;  %1566 = vmatmul.mubr.msk.bf16.gmra.mrb[16].mxu0 %vm99_vm2, %v267_v37 }
  0x33   :  { %1613 = vmatprep.mubr.msk.bf16.mxu0 %vm1808_vm0, %v1807_v0  ;;  %1585 = vmatprep.mubr.msk.bf16.mxu1 %vm1808_vm0, %v1807_v0 }
  0x34   :  { %1606 = vmatpush3.bf16.msra.mxu0 %v1765_v45  ;;  %1578 = vmatpush3.bf16.msra.mxu1 %v1770_v50 }
  0x35   :  { %1607 = vmatprep.subr.bf16.mxu0 %v1807_v0  ;;  %1579 = vmatprep.subr.bf16.mxu1 %v1807_v0 }
  0x38   :  { %1608 = vmatpush3.bf16.msra.mxu0 %v1767_v47  ;;  %1580 = vmatpush3.bf16.msra.mxu1 %v1772_v52 }
  0x39   :  { %1609 = vmatprep.subr.bf16.mxu0 %v1807_v0  ;;  %1581 = vmatprep.subr.bf16.mxu1 %v1807_v0 }
  0x3c   :  { %1610 = vmatpush3.bf16.msra.mxu0 %v1769_v49  ;;  %1582 = vmatpush3.bf16.msra.mxu1 %v1773_v53 }
  0x3d   :  { %1611 = vmatprep.subr.bf16.mxu0 %v1807_v0  ;;  %1583 = vmatprep.subr.bf16.mxu1 %v1807_v0 }
  0x40   :  { %1612 = vmatpush3.bf16.msra.mxu0 %v1771_v51  ;;  %1584 = vmatpush3.bf16.msra.mxu1 %v1774_v54 }
  0x41   :  { %1653 = vmatprep.subr.bf16.mxu0 %v1807_v0  ;;  %1625 = vmatprep.subr.bf16.mxu1 %v1807_v0 }
  0xe5   :  { %v143_v55 = vpop.f32.mrb[0].mxu0  ;;  %v159_v56 = vpop.f32.mrb[0].mxu1 }
  0xe6   :  { %v1519_v57 = vpop.f32.mrb[1].mxu0  ;;  %v1527_v58 = vpop.f32.mrb[1].mxu1 }
  0xe7   :  { %v146_v59 = vpop.f32.mrb[2].mxu0  ;;  %v162_v60 = vpop.f32.mrb[2].mxu1 }
  0xe8   :  { %v1520_v61 = vpop.f32.mrb[3].mxu0  ;;  %v1528_v62 = vpop.f32.mrb[3].mxu1 }
  0xe9   :  { %v1775_v61 = vld [vmem:[%s2274_s3 + $0x80] sm:$0xff]  }
  0xed   :  { %v151_v63 = vpop.f32.mrb[4].mxu0 }
  0xee   :  { %v1523_v1 = vpop.f32.mrb[5].mxu0 }
  0xef   :  { %v154_v2 = vpop.f32.mrb[6].mxu0 }
  0xf0   :  { %v1524_v3 = vpop.f32.mrb[7].mxu0 }
  0xf5   :  { %v229_v4 = vpop.f32.mrb[4].mxu1  ;;  %v336_v5 = vpop.f32.mrb[8].mxu0 }
  0xf6   :  { %v230_v6 = vadd.f32 %v229_v4, %v143_v55  ;;  %v1539_v7 = vpop.f32.mrb[5].mxu1  ;;  %v1559_v8 = vpop.f32.mrb[9].mxu0 }
  0xf7   :  { %v232_v10 = vpop.f32.mrb[6].mxu1  ;;  %v339_v11 = vpop.f32.mrb[10].mxu0  ;;  %v1777_v7 = vld [vmem:[%s2274_s3 + $0x90] sm:$0xff]  }
  0xf8   :  { %v358_v12 = vadd.f32 %v336_v5, %v230_v6  ;;  %v233_v13 = vadd.f32 %v232_v10, %v146_v59  ;;  %v1540_v14 = vpop.f32.mrb[7].mxu1  ;;  %v1560_v15 = vpop.f32.mrb[11].mxu0  ;;  %v1779_v10 = vld [vmem:[%s2274_s3 + $0xa0] sm:$0xff]  }
  0xf9   :  { %v1782_v14 = vld [vmem:[%s2274_s3 + $0xb8] sm:$0xff]  }
  0xfa   :  { %v2042_v16 = vadd.f32 %v1304_v9, %v358_v12  ;;  %v359_v17 = vadd.f32 %v339_v11, %v233_v13  ;;  %v1780_v12 = vld [vmem:[%s2274_s3 + $0xa8] sm:$0xff]   ;;  %v1781_v13 = vld [vmem:[%s2274_s3 + $0xb0] sm:$0xff]  }
  0xfc   :  { %v375_v18 = vmax.f32 %v2042_v16, 0.0  ;;  %v2045_v19 = vadd.f32 %v1304_v9, %v359_v17 }
  0xfd   :  { %v237_v20 = vpop.f32.mrb[8].mxu1  ;;  %v344_v21 = vpop.f32.mrb[12].mxu0 }
  0xfe   :  { %380 = vst [vmem:[#allocation2 + $0x1] sm:$0xff] %v375_v18  ;;  %v376_v22 = vmax.f32 %v2045_v19, 0.0  ;;  %v238_v23 = vadd.f32 %v237_v20, %v151_v63  ;;  %v1543_v24 = vpop.f32.mrb[9].mxu1  ;;  %v1563_v25 = vpop.f32.mrb[13].mxu0 }
  0xff   :  { %v240_v26 = vpop.f32.mrb[10].mxu1  ;;  %v347_v27 = vpop.f32.mrb[14].mxu0  ;;  %v1783_v24 = vld [vmem:[%s2276_s5] sm:$0xff]   ;;  %v1784_v25 = vld [vmem:[%s2276_s5 + $0x8] sm:$0xff]  }
 0x100   :  { %381 = vst [vmem:[#allocation2 + $0x9] sm:$0xff] %v376_v22  ;;  %v360_v28 = vadd.f32 %v344_v21, %v238_v23  ;;  %v241_v29 = vadd.f32 %v240_v26, %v154_v2  ;;  %v1544_v30 = vpop.f32.mrb[11].mxu1  ;;  %v1564_v31 = vpop.f32.mrb[15].mxu0  ;;  %v1776_v2 = vld [vmem:[%s2274_s3 + $0x88] sm:$0xff]   ;;  %v1785_v26 = vld [vmem:[%s2276_s5 + $0x10] sm:$0xff]  }
 0x101   :  { %v1789_v30 = vld [vmem:[%s2276_s5 + $0x20] sm:$0xff]   ;;  %v1790_v31 = vld [vmem:[%s2276_s5 + $0x50] sm:$0xff]  }
 0x102   :  { %v2052_v32 = vadd.f32 %v1304_v9, %v360_v28  ;;  %v361_v33 = vadd.f32 %v347_v27, %v241_v29  ;;  %v1786_v27 = vld [vmem:[%s2276_s5 + $0x40] sm:$0xff]   ;;  %v1787_v28 = vld [vmem:[%s2276_s5 + $0x18] sm:$0xff]   ;;  %v1788_v29 = vld [vmem:[%s2276_s5 + $0x48] sm:$0xff]  }
 0x104   :  { %v377_v34 = vmax.f32 %v2052_v32, 0.0  ;;  %v2055_v35 = vadd.f32 %v1304_v9, %v361_v33  ;;  %v1791_v33 = vld [vmem:[%s2276_s5 + $0x28] sm:$0xff]  }
 0x105   :  { %v245_v36 = vpop.f32.mrb[12].mxu1  ;;  %v352_v37 = vpop.f32.mrb[16].mxu0  ;;  %v388_v42 = vld [vmem:[#allocation2] sm:$0xff] }
 0x106   :  { %382 = vst [vmem:[#allocation2 + $0x11] sm:$0xff] %v377_v34  ;;  %v378_v38 = vmax.f32 %v2055_v35, 0.0  ;;  %v246_v39 = vadd.f32 %v245_v36, %v159_v56  ;;  %v1547_v40 = vpop.f32.mrb[13].mxu1  ;;  %v1567_v41 = vpop.f32.mrb[17].mxu0  ;;  %v1792_v36 = vld [vmem:[%s2276_s5 + $0x58] sm:$0xff]  }
 0x107   :  { %387 = vst [vmem:[#allocation2 + $0x11] sm:$0x1] %v1807_v0  ;;  %v389_v43 = vld [vmem:[#allocation2 + $0x8] sm:$0xff]  ;;  %v248_v44 = vpop.f32.mrb[14].mxu1  ;;  %v355_v45 = vpop.f32.mrb[18].mxu0  ;;  %v1795_v40 = vld [vmem:[%s2276_s5 + $0x38] sm:$0xff]  }
 0x108   :  { %383 = vst [vmem:[#allocation2 + $0x19] sm:$0xff] %v378_v38  ;;  %v362_v46 = vadd.f32 %v352_v37, %v246_v39  ;;  %v2063_v47 = vpack.c.bf16 %v389_v43, %v388_v42  ;;  %v1548_v48 = vpop.f32.mrb[15].mxu1  ;;  %v1568_v49 = vpop.f32.mrb[19].mxu0  ;;  %v1793_v37 = vld [vmem:[%s2276_s5 + $0x30] sm:$0xff]   ;;  %v1794_v39 = vld [vmem:[%s2276_s5 + $0x60] sm:$0xff]   ;;  %v1796_v41 = vld [vmem:[%s2276_s5 + $0x68] sm:$0xff]  }
 0x109   :  { %v1797_v42 = vld [vmem:[%s2276_s5 + $0x70] sm:$0xff]   ;;  %v1798_v43 = vld [vmem:[%s2276_s5 + $0x78] sm:$0xff]  }
 0x10a   :  { %v2065_v50 = vadd.f32 %v1304_v9, %v362_v46  ;;  %1614 = vmatmul.mubr.bf16.vlgmr.msra.gmra.mrb[20].mxu0 %v2063_v47  ;;  %v432_v52 = vshll.u32 %v2063_v47, 16  ;;  %v430_v57 = vshrl.u32 %v2063_v47, 16  ;;  %v1778_v9 = vld [vmem:[%s2274_s3 + $0x98] sm:$0xff]   ;;  %v682_v17 = vrot.slane %v2063_v47, 1 }
 0x10b   :  { %1617 = vmatprep.mubr.msk.bf16.mxu0 %vm1808_vm0, %v1807_v0  ;;  %1654 = vmatpush3.bf16.msra.mxu0 %v1786_v27 }
 0x10c   :  { %v379_v51 = vmax.f32 %v2065_v50, 0.0  ;;  %v434_v56 = vrot.slane %v432_v52, 1  ;;  %1655 = vmatprep.subr.bf16.mxu0 %v1807_v0 }
 0x10e   :  { %384 = vst [vmem:[#allocation2 + $0x21] sm:$0x1] %v379_v51  ;;  %v390_v53 = vld [vmem:[#allocation2 + $0x10] sm:$0xff]  ;;  %v435_v59 = vor.u32 %v434_v56, %v430_v57 }
 0x10f   :  { %v391_v54 = vld [vmem:[#allocation2 + $0x18] sm:$0xff]  ;;  %1656 = vmatpush3.bf16.msra.mxu0 %v1788_v29 }
 0x110   :  { %v394_v55 = vpack.c.bf16 %v391_v54, %v390_v53  ;;  %1657 = vmatprep.subr.bf16.mxu0 %v1807_v0 }
 0x112   :  { %1618 = vmatmul.mubr.bf16.gmra.mrb[24].mxu0 %v394_v55  ;;  %v437_v58 = vshll.u32 %v394_v55, 16  ;;  %v441_v4 = vshrl.u32 %v394_v55, 16  ;;  %v683_v15 = vrot.slane %v394_v55, 1 }
 0x113   :  { %1621 = vmatprep.mubr.msk.bf16.mxu0 %vm1808_vm0, %v1807_v0  ;;  %1658 = vmatpush3.bf16.msra.mxu0 %v1790_v31 }
 0x114   :  { %v439_v60 = vrot.slane %v437_v58, 1  ;;  %v684_v20 = vsel %vm263_vm3, %v682_v17, %v683_v15  ;;  %1659 = vmatprep.subr.bf16.mxu0 %v1807_v0 }
 0x115   :  { %v392_v62 = vld [vmem:[#allocation2 + $0x20] sm:$0x7] }
 0x116   :  { %v440_v63 = vsel %vm52_vm1, %v435_v59, %v439_v60  ;;  %v395_v1 = vpack.c.bf16 %v392_v62, %v392_v62  ;;  %v443_v6 = vor.u32 %v441_v4, %v439_v60 }
 0x117   :  { %1586 = vmatmul.mubr.bf16.vlgmr.msra.gmra.mrb[16].mxu1 %v440_v63  ;;  %1660 = vmatpush3.bf16.msra.mxu0 %v1792_v36 }
 0x118   :  { %1626 = vmatpush3.bf16.msra.mxu1 %v1775_v61  ;;  %1589 = vmatprep.mubr.msk.bf16.mxu1 %vm1808_vm0, %v1807_v0  ;;  %v445_v3 = vshll.u32 %v395_v1, 16  ;;  %v449_v11 = vshrl.u32 %v395_v1, 16  ;;  %v685_v21 = vrot.slane %v395_v1, 1 }
 0x119   :  { %1627 = vmatprep.subr.bf16.mxu1 %v1807_v0  ;;  %1661 = vmatprep.subr.bf16.mxu0 %v1807_v0 }
 0x11a   :  { %1622 = vmatmul.mubr.bf16.gmra.mrb[28].mxu0 %v395_v1  ;;  %v447_v5 = vrot.slane %v445_v3, 1  ;;  %v686_v23 = vsel %vm263_vm3, %v683_v15, %v685_v21 }
 0x11b   :  { %1669 = vmatprep.mubr.msk.bf16.mxu0 %vm1808_vm0, %v1807_v0  ;;  %1662 = vmatpush3.bf16.msra.mxu0 %v1794_v39 }
 0x11c   :  { %1628 = vmatpush3.bf16.msra.mxu1 %v1776_v2  ;;  %v448_v8 = vsel %vm52_vm1, %v443_v6, %v447_v5  ;;  %1663 = vmatprep.subr.bf16.mxu0 %v1807_v0 }
 0x11d   :  { %1629 = vmatprep.subr.bf16.mxu1 %v1807_v0 }
 0x11f   :  { %1590 = vmatmul.mubr.bf16.gmra.mrb[20].mxu1 %v448_v8  ;;  %1664 = vmatpush3.bf16.msra.mxu0 %v1796_v41 }
 0x120   :  { %1630 = vmatpush3.bf16.msra.mxu1 %v1777_v7  ;;  %1593 = vmatprep.mubr.msk.bf16.mxu1 %vm1808_vm0, %v1807_v0 }
 0x121   :  { %1631 = vmatprep.subr.bf16.mxu1 %v1807_v0  ;;  %1665 = vmatprep.subr.bf16.mxu0 %v1807_v0 }
 0x123   :  { %1666 = vmatpush3.bf16.msra.mxu0 %v1797_v42 }
 0x124   :  { %1632 = vmatpush3.bf16.msra.mxu1 %v1778_v9  ;;  %1667 = vmatprep.subr.bf16.mxu0 %v1807_v0 }
 0x125   :  { %1633 = vmatprep.subr.bf16.mxu1 %v1807_v0 }
 0x127   :  { %1594 = vmatmul.mubr.bf16.gmra.mrb[24].mxu1 %v449_v11  ;;  %1668 = vmatpush3.bf16.msra.mxu0 %v1798_v43 }
 0x128   :  { %1634 = vmatpush3.bf16.msra.mxu1 %v1779_v10  ;;  %1641 = vmatprep.mubr.msk.bf16.mxu1 %vm1808_vm0, %v1807_v0 }
 0x129   :  { %1635 = vmatprep.subr.bf16.mxu1 %v1807_v0  ;;  %1709 = vmatprep.subr.bf16.mxu0 %v1807_v0 }
 0x12c   :  { %1636 = vmatpush3.bf16.msra.mxu1 %v1780_v12 }
 0x12d   :  { %1637 = vmatprep.subr.bf16.mxu1 %v1807_v0 }
 0x130   :  { %1638 = vmatpush3.bf16.msra.mxu1 %v1781_v13  ;;  %v1361_v13 = vld [vmem:[%s2277_s4] ss:$0 sm:$0xff] }
 0x131   :  { %1639 = vmatprep.subr.bf16.mxu1 %v1807_v0 }
 0x134   :  { %1640 = vmatpush3.bf16.msra.mxu1 %v1782_v14 }
 0x135   :  { %1681 = vmatprep.subr.bf16.mxu1 %v1807_v0 }
 0x137   :  { %1642 = vmatmul.mubr.bf16.vlgmr.msra.gmra.mrb[28].mxu1 %v684_v20 }
 0x138   :  { %1645 = vmatprep.mubr.msk.bf16.mxu1 %vm1808_vm0, %v1807_v0  ;;  %1682 = vmatpush3.bf16.msra.mxu1 %v1783_v24 }
 0x139   :  { %1683 = vmatprep.subr.bf16.mxu1 %v1807_v0 }
 0x13c   :  { %1684 = vmatpush3.bf16.msra.mxu1 %v1784_v25 }
 0x13d   :  { %1685 = vmatprep.subr.bf16.mxu1 %v1807_v0 }
 0x13f   :  { %1646 = vmatmul.mubr.bf16.gmra.mrb[32].mxu1 %v686_v23 }
 0x140   :  { %1649 = vmatprep.mubr.msk.bf16.mxu1 %vm1808_vm0, %v1807_v0  ;;  %1686 = vmatpush3.bf16.msra.mxu1 %v1785_v26 }
 0x141   :  { %1687 = vmatprep.subr.bf16.mxu1 %v1807_v0 }
 0x144   :  { %1688 = vmatpush3.bf16.msra.mxu1 %v1787_v28 }
 0x145   :  { %1689 = vmatprep.subr.bf16.mxu1 %v1807_v0 }
 0x147   :  { %1650 = vmatmul.mubr.bf16.gmra.mrb[36].mxu1 %v685_v21 }
 0x148   :  { %1697 = vmatprep.mubr.msk.bf16.mxu1 %vm1808_vm0, %v1807_v0  ;;  %1690 = vmatpush3.bf16.msra.mxu1 %v1789_v30 }
 0x149   :  { %1691 = vmatprep.subr.bf16.mxu1 %v1807_v0 }
 0x14c   :  { %1692 = vmatpush3.bf16.msra.mxu1 %v1791_v33 }
 0x14d   :  { %1693 = vmatprep.subr.bf16.mxu1 %v1807_v0 }
 0x150   :  { %1694 = vmatpush3.bf16.msra.mxu1 %v1793_v37 }
 0x151   :  { %1695 = vmatprep.subr.bf16.mxu1 %v1807_v0 }
 0x154   :  { %1696 = vmatpush3.bf16.msra.mxu1 %v1795_v40 }
 0x1dd   :  { %v640_v44 = vpop.f32.mrb[20].mxu0 }
 0x1de   :  { %v1615_v45 = vpop.f32.mrb[21].mxu0 }
 0x1df   :  { %v643_v46 = vpop.f32.mrb[22].mxu0 }
 0x1e0   :  { %v1616_v47 = vpop.f32.mrb[23].mxu0 }
 0x1e5   :  { %v648_v48 = vpop.f32.mrb[24].mxu0 }
 0x1e6   :  { %v1619_v49 = vpop.f32.mrb[25].mxu0 }
 0x1e7   :  { %v651_v52 = vpop.f32.mrb[26].mxu0 }
 0x1e8   :  { %v1620_v53 = vpop.f32.mrb[27].mxu0 }
 0x1ea   :  { %v536_v54 = vpop.f32.mrb[16].mxu1 }
 0x1eb   :  { %v641_v55 = vadd.f32 %v640_v44, %v536_v54  ;;  %v1587_v56 = vpop.f32.mrb[17].mxu1 }
 0x1ec   :  { %v539_v57 = vpop.f32.mrb[18].mxu1 }
 0x1ed   :  { %v644_v58 = vadd.f32 %v643_v46, %v539_v57  ;;  %v1588_v59 = vpop.f32.mrb[19].mxu1  ;;  %v656_v60 = vpop.f32.mrb[28].mxu0 }
 0x1ee   :  { %v1623_v61 = vpop.f32.mrb[29].mxu0 }
 0x1ef   :  { %v659_v62 = vpop.f32.mrb[30].mxu0 }
 0x1f0   :  { %v1624_v63 = vpop.f32.mrb[31].mxu0  ;;  %v1799_v62 = vld [vmem:[%s2276_s5 + $0x80] sm:$0xff]  }
 0x1f2   :  { %v544_v1 = vpop.f32.mrb[20].mxu1 }
 0x1f3   :  { %v649_v2 = vadd.f32 %v648_v48, %v544_v1  ;;  %v1591_v3 = vpop.f32.mrb[21].mxu1 }
 0x1f4   :  { %v547_v4 = vpop.f32.mrb[22].mxu1  ;;  %v1800_v3 = vld [vmem:[%s2276_s5 + $0x88] sm:$0xff]  }
 0x1f5   :  { %v652_v5 = vadd.f32 %v651_v52, %v547_v4  ;;  %v1592_v6 = vpop.f32.mrb[23].mxu1 }
 0x1fa   :  { %v552_v7 = vpop.f32.mrb[24].mxu1 }
 0x1fb   :  { %v657_v8 = vadd.f32 %v656_v60, %v552_v7  ;;  %v1595_v9 = vpop.f32.mrb[25].mxu1 }
 0x1fc   :  { %v555_v10 = vpop.f32.mrb[26].mxu1 }
 0x1fd   :  { %v1596_v11 = vpop.f32.mrb[27].mxu1  ;;  %v1802_v10 = vld [vmem:[%s2276_s5 + $0x98] sm:$0xff]  }
 0x1fe   :  { %v1803_v11 = vld [vmem:[%s2276_s5 + $0xa0] sm:$0xff]  }
 0x20a   :  { %v772_v12 = vpop.f32.mrb[28].mxu1 }
 0x20b   :  { %v794_v14 = vadd.f32 %v772_v12, %v641_v55  ;;  %v1643_v15 = vpop.f32.mrb[29].mxu1 }
 0x20c   :  { %v775_v17 = vpop.f32.mrb[30].mxu1  ;;  %v1806_v15 = vld [vmem:[%s2276_s5 + $0xb8] sm:$0xff]  }
 0x20d   :  { %v806_v20 = vadd.f32 %v1361_v13, %v794_v14  ;;  %v795_v21 = vadd.f32 %v775_v17, %v644_v58  ;;  %v1644_v23 = vpop.f32.mrb[31].mxu1  ;;  %v1805_v14 = vld [vmem:[%s2276_s5 + $0xb0] sm:$0xff]  }
 0x20f   :  { %v811_v24 = vmax.f32 %v806_v20, 0.0  ;;  %v807_v25 = vadd.f32 %v1361_v13, %v795_v21 }
 0x211   :  { %816 = vst [vmem:[#allocation3 + $0x1] sm:$0xff] %v811_v24  ;;  %v812_v26 = vmax.f32 %v807_v25, 0.0 }
 0x212   :  { %v780_v27 = vpop.f32.mrb[32].mxu1 }
 0x213   :  { %817 = vst [vmem:[#allocation3 + $0x9] sm:$0xff] %v812_v26  ;;  %v796_v28 = vadd.f32 %v780_v27, %v649_v2  ;;  %v1647_v29 = vpop.f32.mrb[33].mxu1 }
 0x214   :  { %v783_v30 = vpop.f32.mrb[34].mxu1 }
 0x215   :  { %v808_v31 = vadd.f32 %v1361_v13, %v796_v28  ;;  %v797_v33 = vadd.f32 %v783_v30, %v652_v5  ;;  %v1648_v36 = vpop.f32.mrb[35].mxu1 }
 0x217   :  { %v813_v37 = vmax.f32 %v808_v31, 0.0  ;;  %v809_v39 = vadd.f32 %v1361_v13, %v797_v33 }
 0x218   :  { %v824_v42 = vld [vmem:[#allocation3] sm:$0xff] }
 0x219   :  { %818 = vst [vmem:[#allocation3 + $0x11] sm:$0xff] %v813_v37  ;;  %v814_v40 = vmax.f32 %v809_v39, 0.0 }
 0x21a   :  { %823 = vst [vmem:[#allocation3 + $0x11] sm:$0x1] %v1807_v0  ;;  %v788_v41 = vpop.f32.mrb[36].mxu1  ;;  %v825_v43 = vld [vmem:[#allocation3 + $0x8] sm:$0xff] }
 0x21b   :  { %819 = vst [vmem:[#allocation3 + $0x19] sm:$0xff] %v814_v40  ;;  %v798_v44 = vadd.f32 %v788_v41, %v657_v8  ;;  %v1651_v45 = vpop.f32.mrb[37].mxu1  ;;  %v829_v46 = vpack.c.bf16 %v825_v43, %v824_v42  ;;  %v1801_v8 = vld [vmem:[%s2276_s5 + $0x90] sm:$0xff]  }
 0x21c   :  { %v791_v47 = vpop.f32.mrb[38].mxu1 }
 0x21d   :  { %v810_v48 = vadd.f32 %v1361_v13, %v798_v44  ;;  %v1652_v49 = vpop.f32.mrb[39].mxu1  ;;  %1698 = vmatmul.mubr.bf16.vlgmr.msra.gmra.mrb[40].mxu1 %v829_v46  ;;  %v868_v53 = vshll.u32 %v829_v46, 16  ;;  %v866_v58 = vshrl.u32 %v829_v46, 16  ;;  %v1804_v13 = vld [vmem:[%s2276_s5 + $0xa8] sm:$0xff]   ;;  %v1118_v20 = vrot.slane %v829_v46, 1 }
 0x21e   :  { %1701 = vmatprep.mubr.msk.bf16.mxu1 %vm1808_vm0, %v1807_v0 }
 0x21f   :  { %v815_v52 = vmax.f32 %v810_v48, 0.0  ;;  %v870_v57 = vrot.slane %v868_v53, 1 }
 0x221   :  { %820 = vst [vmem:[#allocation3 + $0x21] sm:$0x1] %v815_v52  ;;  %v826_v54 = vld [vmem:[#allocation3 + $0x10] sm:$0xff]  ;;  %v871_v60 = vor.u32 %v870_v57, %v866_v58 }
 0x222   :  { %v827_v55 = vld [vmem:[#allocation3 + $0x18] sm:$0xff] }
 0x223   :  { %v830_v56 = vpack.c.bf16 %v827_v55, %v826_v54 }
 0x225   :  { %1702 = vmatmul.mubr.bf16.gmra.mrb[44].mxu1 %v830_v56  ;;  %v873_v59 = vshll.u32 %v830_v56, 16  ;;  %v877_v5 = vshrl.u32 %v830_v56, 16  ;;  %v1119_v17 = vrot.slane %v830_v56, 1 }
 0x226   :  { %1705 = vmatprep.mubr.msk.bf16.mxu1 %vm1808_vm0, %v1807_v0 }
 0x227   :  { %v875_v61 = vrot.slane %v873_v59, 1  ;;  %v1120_v21 = vsel %vm263_vm3, %v1118_v20, %v1119_v17 }
 0x228   :  { %v828_v63 = vld [vmem:[#allocation3 + $0x20] sm:$0x7] }
 0x229   :  { %v876_v1 = vsel %vm52_vm1, %v871_v60, %v875_v61  ;;  %v831_v2 = vpack.c.bf16 %v828_v63, %v828_v63  ;;  %v879_v7 = vor.u32 %v877_v5, %v875_v61  ;;  %v1418_v60 = vld [vmem:[%s2278_s6] ss:$0 sm:$0xff] }
 0x22a   :  { %1670 = vmatmul.mubr.bf16.vlgmr.msra.gmra.mrb[32].mxu0 %v876_v1 }
 0x22b   :  { %1710 = vmatpush3.bf16.msra.mxu0 %v1799_v62  ;;  %1673 = vmatprep.mubr.msk.bf16.mxu0 %vm1808_vm0, %v1807_v0  ;;  %v881_v4 = vshll.u32 %v831_v2, 16  ;;  %v885_v12 = vshrl.u32 %v831_v2, 16  ;;  %v1121_v23 = vrot.slane %v831_v2, 1 }
 0x22c   :  { %1711 = vmatprep.subr.bf16.mxu0 %v1807_v0 }
 0x22d   :  { %1706 = vmatmul.mubr.bf16.gmra.mrb[48].mxu1 %v831_v2  ;;  %v883_v6 = vrot.slane %v881_v4, 1  ;;  %v1122_v24 = vsel %vm263_vm3, %v1119_v17, %v1121_v23 }
 0x22f   :  { %1712 = vmatpush3.bf16.msra.mxu0 %v1800_v3  ;;  %v884_v9 = vsel %vm52_vm1, %v879_v7, %v883_v6 }
 0x230   :  { %1713 = vmatprep.subr.bf16.mxu0 %v1807_v0 }
 0x232   :  { %1674 = vmatmul.mubr.bf16.gmra.mrb[36].mxu0 %v884_v9 }
 0x233   :  { %1714 = vmatpush3.bf16.msra.mxu0 %v1801_v8  ;;  %1677 = vmatprep.mubr.msk.bf16.mxu0 %vm1808_vm0, %v1807_v0 }
 0x234   :  { %1715 = vmatprep.subr.bf16.mxu0 %v1807_v0 }
 0x237   :  { %1716 = vmatpush3.bf16.msra.mxu0 %v1802_v10 }
 0x238   :  { %1717 = vmatprep.subr.bf16.mxu0 %v1807_v0 }
 0x23a   :  { %1678 = vmatmul.mubr.bf16.gmra.mrb[40].mxu0 %v885_v12 }
 0x23b   :  { %1718 = vmatpush3.bf16.msra.mxu0 %v1803_v11  ;;  %1725 = vmatprep.mubr.msk.bf16.mxu0 %vm1808_vm0, %v1807_v0 }
 0x23c   :  { %1719 = vmatprep.subr.bf16.mxu0 %v1807_v0 }
 0x23f   :  { %1720 = vmatpush3.bf16.msra.mxu0 %v1804_v13 }
 0x240   :  { %1721 = vmatprep.subr.bf16.mxu0 %v1807_v0 }
 0x243   :  { %1722 = vmatpush3.bf16.msra.mxu0 %v1805_v14 }
 0x244   :  { %1723 = vmatprep.subr.bf16.mxu0 %v1807_v0 }
 0x247   :  { %1724 = vmatpush3.bf16.msra.mxu0 %v1806_v15 }
 0x24a   :  { %1726 = vmatmul.mubr.bf16.vlgmr.msra.gmra.mrb[44].mxu0 %v1120_v21 }
 0x24b   :  { %1729 = vmatprep.mubr.msk.bf16.mxu0 %vm1808_vm0, %v1807_v0 }
 0x252   :  { %1730 = vmatmul.mubr.bf16.gmra.mrb[48].mxu0 %v1122_v24 }
 0x253   :  { %1733 = vmatprep.mubr.msk.bf16.mxu0 %vm1808_vm0, %v1807_v0 }
 0x25a   :  { %1734 = vmatmul.mubr.bf16.gmra.mrb[52].mxu0 %v1121_v23 }
 0x2f0   :  { %v1076_v25 = vpop.f32.mrb[40].mxu1 }
 0x2f1   :  { %v1699_v26 = vpop.f32.mrb[41].mxu1 }
 0x2f2   :  { %v1079_v27 = vpop.f32.mrb[42].mxu1 }
 0x2f3   :  { %v1700_v28 = vpop.f32.mrb[43].mxu1 }
 0x2f8   :  { %v1084_v29 = vpop.f32.mrb[44].mxu1 }
 0x2f9   :  { %v1703_v30 = vpop.f32.mrb[45].mxu1 }
 0x2fa   :  { %v1087_v31 = vpop.f32.mrb[46].mxu1 }
 0x2fb   :  { %v1704_v33 = vpop.f32.mrb[47].mxu1 }
 0x2fd   :  { %v972_v36 = vpop.f32.mrb[32].mxu0 }
 0x2fe   :  { %v1077_v37 = vadd.f32 %v1076_v25, %v972_v36  ;;  %v1671_v39 = vpop.f32.mrb[33].mxu0 }
 0x2ff   :  { %v975_v40 = vpop.f32.mrb[34].mxu0 }
 0x300   :  { %v1080_v41 = vadd.f32 %v1079_v27, %v975_v40  ;;  %v1672_v42 = vpop.f32.mrb[35].mxu0  ;;  %v1092_v43 = vpop.f32.mrb[48].mxu1 }
 0x301   :  { %v1707_v44 = vpop.f32.mrb[49].mxu1 }
 0x302   :  { %v1095_v45 = vpop.f32.mrb[50].mxu1 }
 0x303   :  { %v1708_v46 = vpop.f32.mrb[51].mxu1 }
 0x305   :  { %v980_v0 = vpop.f32.mrb[36].mxu0 }
 0x306   :  { %v1085_v47 = vadd.f32 %v1084_v29, %v980_v0  ;;  %v1675_v48 = vpop.f32.mrb[37].mxu0 }
 0x307   :  { %v983_v49 = vpop.f32.mrb[38].mxu0 }
 0x308   :  { %v1088_v52 = vadd.f32 %v1087_v31, %v983_v49  ;;  %v1676_v53 = vpop.f32.mrb[39].mxu0 }
 0x30d   :  { %v988_v54 = vpop.f32.mrb[40].mxu0 }
 0x30e   :  { %v1093_v55 = vadd.f32 %v1092_v43, %v988_v54  ;;  %v1679_v56 = vpop.f32.mrb[41].mxu0 }
 0x30f   :  { %v991_v57 = vpop.f32.mrb[42].mxu0 }
 0x310   :  { %v1680_v58 = vpop.f32.mrb[43].mxu0 }
 0x31d   :  { %v1208_v59 = vpop.f32.mrb[44].mxu0 }
 0x31e   :  { %v1230_v61 = vadd.f32 %v1208_v59, %v1077_v37  ;;  %v1727_v62 = vpop.f32.mrb[45].mxu0 }
 0x31f   :  { %v1211_v63 = vpop.f32.mrb[46].mxu0 }
 0x320   :  { %v1242_v1 = vadd.f32 %v1418_v60, %v1230_v61  ;;  %v1231_v2 = vadd.f32 %v1211_v63, %v1080_v41  ;;  %v1728_v3 = vpop.f32.mrb[47].mxu0 }
 0x322   :  { %v1247_v4 = vadd.f32 %v1242_v1, %v375_v18  ;;  %v1243_v5 = vadd.f32 %v1418_v60, %v1231_v2 }
 0x324   :  { %v1252_v6 = vmax.f32 %v1247_v4, 0.0  ;;  %v1248_v7 = vadd.f32 %v1243_v5, %v376_v22 }
 0x325   :  { %v1216_v8 = vpop.f32.mrb[48].mxu0 }
 0x326   :  { %1257 = vst [vmem:[%s2279_s7] sm:$0xff] %v1252_v6  ;;  %v1253_v9 = vmax.f32 %v1248_v7, 0.0  ;;  %v1232_v10 = vadd.f32 %v1216_v8, %v1085_v47  ;;  %v1731_v11 = vpop.f32.mrb[49].mxu0 }
 0x327   :  { %v1219_v12 = vpop.f32.mrb[50].mxu0 }
 0x328   :  { %1258 = vst [vmem:[%s2279_s7 + $0x8] sm:$0xff] %v1253_v9  ;;  %v1244_v16 = vadd.f32 %v1418_v60, %v1232_v10  ;;  %v1233_v18 = vadd.f32 %v1219_v12, %v1088_v52  ;;  %v1732_v13 = vpop.f32.mrb[51].mxu0 }
 0x32a   :  { %v1249_v19 = vadd.f32 %v1244_v16, %v377_v34  ;;  %v1245_v22 = vadd.f32 %v1418_v60, %v1233_v18 }
 0x32c   :  { %v1254_v14 = vmax.f32 %v1249_v19, 0.0  ;;  %v1250_v15 = vadd.f32 %v1245_v22, %v378_v38 }
 0x32d   :  { %v1224_v17 = vpop.f32.mrb[52].mxu0 }
 0x32e   :  { %1419 = vst [vmem:[%s2279_s7 + $0xf] sm:$0xfe] %v1254_v14  ;;  %v1255_v20 = vmax.f32 %v1250_v15, 0.0  ;;  %v1234_v21 = vadd.f32 %v1224_v17, %v1093_v55  ;;  %v1735_v23 = vpop.f32.mrb[53].mxu0 }
 0x32f   :  { %v1227_v24 = vpop.f32.mrb[54].mxu0 }
 0x330   :  { %1420 = vst [vmem:[%s2279_s7 + $0x17] sm:$0xff] %v1255_v20  ;;  %v1246_v32 = vadd.f32 %v1418_v60, %v1234_v21  ;;  %v1736_v34 = vpop.f32.mrb[55].mxu0 }
 0x332   :  { %v1251_v25 = vadd.f32 %v1246_v32, %v379_v51 }
 0x334   :  { %v1256_v35 = vmax.f32 %v1251_v25, 0.0 }
 0x336   :  { %1421 = vst [vmem:[%s2279_s7 + $0x1f] sm:$0x1] %v1256_v35 }

</bundles_post_ra>
